<compile_context>
chip_gen: v5e
topology: v5e:2x2
jax: 0.10.0
libtpu: 0.0.40
codegen_flags: <defaults>
</compile_context>

<pallas_src>
import jax
import jax.numpy as jnp
from jax.experimental import pallas as pl
from jax.experimental.pallas import tpu as pltpu

LANES = 128
NEG_INF_BIAS = -1e30  # bias for padded head columns -> exp() underflows to 0


def ddpg_actor_kernel(x_ref, w1_ref, b1_ref, w2_ref, b2_ref, w3_ref, b3_ref,
                      o_ref):
    """Fused MLP (Linear->ReLU->Linear->ReLU->Linear) + softmax head.

    Weights are in the compute dtype (f32 default, optionally bf16); biases,
    matmul accumulation, ReLU and softmax are f32.  The head weights/bias are
    lane-padded to 128 columns (zero weights, -1e30 bias) so the logits /
    softmax work on a full vreg row; only the real action_dim columns are
    stored to HBM.
    """
    cdt = w1_ref.dtype  # compute dtype for MXU inputs

    x = x_ref[...].astype(cdt)  # in-kernel cast (no-op for f32), hides under DMA

    # Hidden layer 1: Linear + ReLU
    h1 = jnp.dot(x, w1_ref[...], preferred_element_type=jnp.float32)
    h1 = jnp.maximum(h1 + b1_ref[...], 0.0)

    # Hidden layer 2: Linear + ReLU
    h2 = jnp.dot(h1.astype(cdt), w2_ref[...], preferred_element_type=jnp.float32)
    h2 = jnp.maximum(h2 + b2_ref[...], 0.0)

    # Output layer: Linear (logits over lane-padded action columns).
    logits = jnp.dot(h2.astype(cdt), w3_ref[...],
                     preferred_element_type=jnp.float32)
    logits = logits + b3_ref[...]  # padded columns carry -1e30 bias

    # Numerically stable softmax; padded columns contribute exp(-1e30 - m) == 0,
    # so the result over the real action_dim columns is exact.  Exact divide:
    # the kernel is DMA/overhead bound, and approx reciprocal broke sum==1.
    m = jnp.max(logits, axis=-1, keepdims=True)
    e = jnp.exp(logits - m)
    denom = jnp.sum(e, axis=-1, keepdims=True)
    probs = e / denom

    # Narrow store: only the real action columns go to HBM (masked vst; the
    # store slot has plenty of slack).
    n_act = o_ref.shape[-1]
    o_ref[...] = probs[:, :n_act].astype(o_ref.dtype)


def prepare_params(params, compute_dtype=jnp.float32):
    """One-time parameter prep (call when weights change, NOT per forward).

    params: (w1, b1, w2, b2, w3, b3) with weights stored [in, out] so the
    kernel computes x @ W + b (== PyTorch x @ W.T with W stored [out, in]).
    Pads the softmax-head weights/bias to a multiple of 128 output columns
    (zero weights, -1e30 bias) and casts MXU inputs to `compute_dtype`.
    """
    w1, b1, w2, b2, w3, b3 = params
    hidden, action_dim = w3.shape
    out_cols = max(LANES, pl.cdiv(action_dim, LANES) * LANES)

    w3p = jnp.zeros((hidden, out_cols), compute_dtype)
    w3p = w3p.at[:, :action_dim].set(w3.astype(compute_dtype))
    b3p = jnp.full((1, out_cols), NEG_INF_BIAS, jnp.float32)
    b3p = b3p.at[:, :action_dim].set(b3.astype(jnp.float32).reshape(1, -1))

    return (w1.astype(compute_dtype),
            b1.astype(jnp.float32).reshape(1, -1),
            w2.astype(compute_dtype),
            b2.astype(jnp.float32).reshape(1, -1),
            w3p, b3p, action_dim)


def _pick_tile(batch, block_batch):
    """Batch-tile size: big tiles to amortize per-step overhead, but keep
    >= 2 grid steps for moderate batches so v7x's two TensorCores both work."""
    if batch <= 16:
        return batch                       # tiny per-env-step batch: one block
    half = max(8, (batch // 2 // 8) * 8)   # multiple of 8, >= 2 grid steps
    return min(block_batch, half)


def ddpg_actor_forward(x, prepped, *, block_batch=2048):
    """DDPGActor forward.

    x: [batch, obs_dim] float32 (or bf16 if produced upstream in bf16).
    prepped: output of prepare_params().
    Returns softmax probabilities of shape [batch, action_dim] (float32).
    """
    w1, b1, w2, b2, w3p, b3p, action_dim = prepped
    batch, obs_dim = x.shape

    tb = _pick_tile(batch, block_batch)
    grid = (pl.cdiv(batch, tb),)   # ragged tail handled by edge-block masking

    def resident(a):
        # Constant block index -> weight/bias tile stays in VMEM across steps.
        return pl.BlockSpec(a.shape, lambda i: (0, 0))

    return pl.pallas_call(
        ddpg_actor_kernel,
        out_shape=jax.ShapeDtypeStruct((batch, action_dim), jnp.float32),
        grid=grid,
        in_specs=[
            pl.BlockSpec((tb, obs_dim), lambda i: (i, 0)),   # streamed x tiles
            resident(w1), resident(b1),
            resident(w2), resident(b2),
            resident(w3p), resident(b3p),
        ],
        out_specs=pl.BlockSpec((tb, action_dim), lambda i: (i, 0)),
        compiler_params=pltpu.CompilerParams(
            # Batch tiles are independent -> shard across v7x's 2 TensorCores.
            dimension_semantics=("parallel",),
        ),
    )(x, w1, b1, w2, b2, w3p, b3p)


def init_params(key, obs_dim, hidden, action_dim):
    """Deterministic init mimicking torch.nn.Linear default (U[-1/sqrt(fan_in), +])."""
    def linear(k, fan_in, fan_out):
        kw, kb = jax.random.split(k)
        bound = 1.0 / jnp.sqrt(jnp.float32(fan_in))
        w = jax.random.uniform(kw, (fan_in, fan_out), jnp.float32, -bound, bound)
        b = jax.random.uniform(kb, (1, fan_out), jnp.float32, -bound, bound)
        return w, b

    k1, k2, k3 = jax.random.split(key, 3)
    w1, b1 = linear(k1, obs_dim, hidden)
    w2, b2 = linear(k2, hidden, hidden)
    w3, b3 = linear(k3, hidden, action_dim)
    return (w1, b1, w2, b2, w3, b3)


def reference_forward(x, params):
    """Plain-JAX f32 reference for sanity checking."""
    w1, b1, w2, b2, w3, b3 = params
    h1 = jnp.maximum(x @ w1 + b1, 0.0)
    h2 = jnp.maximum(h1 @ w2 + b2, 0.0)
    logits = h2 @ w3 + b3
    return jax.nn.softmax(logits, axis=-1)


if __name__ == "__main__":
    obs_dim, action_dim, hidden = 16, 8, 32

    key = jax.random.PRNGKey(0)
    kx_small, kx_big, kp = jax.random.split(key, 3)
    params = init_params(kp, obs_dim, hidden, action_dim)

    # One-time parameter prep (hoisted out of the per-call forward path).
    prepped = prepare_params(params)

    # --- Small per-env-step batch (single block). ---
    x_small = jax.random.normal(kx_small, (4, obs_dim), jnp.float32)
    out_small = jax.block_until_ready(ddpg_actor_forward(x_small, prepped))
    ref_small = reference_forward(x_small, params)
    assert out_small.shape == (4, action_dim)
    assert jnp.allclose(out_small, ref_small, atol=1e-4, rtol=1e-3)
    assert jnp.allclose(jnp.sum(out_small, axis=-1), 1.0, atol=1e-4)

    # --- Larger ragged batch: pipelined multi-step grid with a partial edge
    #     block (no jnp.pad of x; tail stores are masked). ---
    x_big = jax.random.normal(kx_big, (1000, obs_dim), jnp.float32)
    out_big = jax.block_until_ready(
        ddpg_actor_forward(x_big, prepped, block_batch=256))
    ref_big = reference_forward(x_big, params)
    assert out_big.shape == (1000, action_dim)
    assert jnp.allclose(out_big, ref_big, atol=1e-4, rtol=1e-3)
    assert jnp.allclose(jnp.sum(out_big, axis=-1), 1.0, atol=1e-4)

    print("KERNEL_OK")
</pallas_src>

<mosaic_0001>
module attributes {stable_mosaic.version = 11 : i64} {
  func.func @ddpg_actor_kernel(%arg0: i32, %arg1: memref<4x16xf32, #tpu.memory_space<vmem>>, %arg2: memref<16x32xf32, #tpu.memory_space<vmem>>, %arg3: memref<1x32xf32, #tpu.memory_space<vmem>>, %arg4: memref<32x32xf32, #tpu.memory_space<vmem>>, %arg5: memref<1x32xf32, #tpu.memory_space<vmem>>, %arg6: memref<32x128xf32, #tpu.memory_space<vmem>>, %arg7: memref<1x128xf32, #tpu.memory_space<vmem>>, %arg8: memref<4x8xf32, #tpu.memory_space<vmem>>) attributes {dimension_semantics = [#tpu.dimension_semantics<parallel>], iteration_bounds = array<i64: 1>, scalar_prefetch = 0 : i64, scratch_operands = 0 : i64, tpu.core_type = #tpu.core_type<tc>, window_params = [{transform_indices = @transform_0, window_bounds = array<i64: 4, 16>}, {pipeline_mode = #tpu.pipeline_mode<synchronous>, transform_indices = @transform_1, window_bounds = array<i64: 16, 32>}, {pipeline_mode = #tpu.pipeline_mode<synchronous>, transform_indices = @transform_2, window_bounds = array<i64: 1, 32>}, {pipeline_mode = #tpu.pipeline_mode<synchronous>, transform_indices = @transform_3, window_bounds = array<i64: 32, 32>}, {pipeline_mode = #tpu.pipeline_mode<synchronous>, transform_indices = @transform_4, window_bounds = array<i64: 1, 32>}, {pipeline_mode = #tpu.pipeline_mode<synchronous>, transform_indices = @transform_5, window_bounds = array<i64: 32, 128>}, {pipeline_mode = #tpu.pipeline_mode<synchronous>, transform_indices = @transform_6, window_bounds = array<i64: 1, 128>}, {transform_indices = @transform_7, window_bounds = array<i64: 4, 8>}]} {
    %c0 = arith.constant 0 : index
    %c0_0 = arith.constant 0 : index
    %0 = vector.load %arg1[%c0, %c0_0] : memref<4x16xf32, #tpu.memory_space<vmem>>, vector<4x16xf32>
    %c0_1 = arith.constant 0 : index
    %c0_2 = arith.constant 0 : index
    %1 = vector.load %arg2[%c0_1, %c0_2] : memref<16x32xf32, #tpu.memory_space<vmem>>, vector<16x32xf32>
    %cst = arith.constant dense<0.000000e+00> : vector<4x32xf32>
    %2 = tpu.matmul %0, %1, %cst {dimension_numbers = #tpu.dot_dimension_numbers<[1], [0], [0], [1], [0, 0, 1, 1], [], []>} : vector<4x16xf32>, vector<16x32xf32>, vector<4x32xf32> -> vector<4x32xf32>
    %c0_3 = arith.constant 0 : index
    %c0_4 = arith.constant 0 : index
    %3 = vector.load %arg3[%c0_3, %c0_4] : memref<1x32xf32, #tpu.memory_space<vmem>>, vector<1x32xf32>
    %4 = vector.broadcast %3 : vector<1x32xf32> to vector<4x32xf32>
    %5 = arith.addf %2, %4 : vector<4x32xf32>
    %cst_5 = arith.constant 0.000000e+00 : f32
    %6 = vector.broadcast %cst_5 : f32 to vector<4x32xf32>
    %7 = arith.maximumf %5, %6 : vector<4x32xf32>
    %c0_6 = arith.constant 0 : index
    %c0_7 = arith.constant 0 : index
    %8 = vector.load %arg4[%c0_6, %c0_7] : memref<32x32xf32, #tpu.memory_space<vmem>>, vector<32x32xf32>
    %cst_8 = arith.constant dense<0.000000e+00> : vector<4x32xf32>
    %9 = tpu.matmul %7, %8, %cst_8 {dimension_numbers = #tpu.dot_dimension_numbers<[1], [0], [0], [1], [0, 0, 1, 1], [], []>} : vector<4x32xf32>, vector<32x32xf32>, vector<4x32xf32> -> vector<4x32xf32>
    %c0_9 = arith.constant 0 : index
    %c0_10 = arith.constant 0 : index
    %10 = vector.load %arg5[%c0_9, %c0_10] : memref<1x32xf32, #tpu.memory_space<vmem>>, vector<1x32xf32>
    %11 = vector.broadcast %10 : vector<1x32xf32> to vector<4x32xf32>
    %12 = arith.addf %9, %11 : vector<4x32xf32>
    %cst_11 = arith.constant 0.000000e+00 : f32
    %13 = vector.broadcast %cst_11 : f32 to vector<4x32xf32>
    %14 = arith.maximumf %12, %13 : vector<4x32xf32>
    %c0_12 = arith.constant 0 : index
    %c0_13 = arith.constant 0 : index
    %15 = vector.load %arg6[%c0_12, %c0_13] : memref<32x128xf32, #tpu.memory_space<vmem>>, vector<32x128xf32>
    %cst_14 = arith.constant dense<0.000000e+00> : vector<4x128xf32>
    %16 = tpu.matmul %14, %15, %cst_14 {dimension_numbers = #tpu.dot_dimension_numbers<[1], [0], [0], [1], [0, 0, 1, 1], [], []>} : vector<4x32xf32>, vector<32x128xf32>, vector<4x128xf32> -> vector<4x128xf32>
    %c0_15 = arith.constant 0 : index
    %c0_16 = arith.constant 0 : index
    %17 = vector.load %arg7[%c0_15, %c0_16] : memref<1x128xf32, #tpu.memory_space<vmem>>, vector<1x128xf32>
    %18 = vector.broadcast %17 : vector<1x128xf32> to vector<4x128xf32>
    %19 = arith.addf %16, %18 : vector<4x128xf32>
    %cst_17 = arith.constant dense<0xFF800000> : vector<4xf32>
    %20 = vector.multi_reduction <maximumf>, %19, %cst_17 [1] : vector<4x128xf32> to vector<4xf32>
    %21 = vector.shape_cast %20 : vector<4xf32> to vector<4x1xf32>
    %22 = vector.broadcast %21 : vector<4x1xf32> to vector<4x128xf32>
    %23 = arith.subf %19, %22 : vector<4x128xf32>
    %24 = math.exp %23 : vector<4x128xf32>
    %cst_18 = arith.constant dense<0.000000e+00> : vector<4xf32>
    %25 = vector.multi_reduction <add>, %24, %cst_18 [1] : vector<4x128xf32> to vector<4xf32>
    %26 = vector.shape_cast %25 : vector<4xf32> to vector<4x1xf32>
    %27 = vector.broadcast %26 : vector<4x1xf32> to vector<4x128xf32>
    %28 = arith.divf %24, %27 : vector<4x128xf32>
    %29 = vector.extract_strided_slice %28 {offsets = [0, 0], sizes = [4, 8], strides = [1, 1]} : vector<4x128xf32> to vector<4x8xf32>
    %c0_19 = arith.constant 0 : index
    %c0_20 = arith.constant 0 : index
    %30 = vector.load %arg8[%c0_19, %c0_20] : memref<4x8xf32, #tpu.memory_space<vmem>>, vector<4x8xf32>
    tpu.vector_store %arg8[%c0_19, %c0_20], %29 {strides = array<i32>} : memref<4x8xf32, #tpu.memory_space<vmem>>, vector<4x8xf32>,
    return
  }
  func.func @transform_0(%arg0: i32) -> (i32, i32) {
    %c0_i32 = arith.constant 0 : i32
    %c0_i32_0 = arith.constant 0 : i32
    return %arg0, %c0_i32 : i32, i32
  }
  func.func @transform_1(%arg0: i32) -> (i32, i32) {
    %c0_i32 = arith.constant 0 : i32
    %c0_i32_0 = arith.constant 0 : i32
    %c0_i32_1 = arith.constant 0 : i32
    return %c0_i32, %c0_i32_0 : i32, i32
  }
  func.func @transform_2(%arg0: i32) -> (i32, i32) {
    %c0_i32 = arith.constant 0 : i32
    %c0_i32_0 = arith.constant 0 : i32
    %c0_i32_1 = arith.constant 0 : i32
    return %c0_i32, %c0_i32_0 : i32, i32
  }
  func.func @transform_3(%arg0: i32) -> (i32, i32) {
    %c0_i32 = arith.constant 0 : i32
    %c0_i32_0 = arith.constant 0 : i32
    %c0_i32_1 = arith.constant 0 : i32
    return %c0_i32, %c0_i32_0 : i32, i32
  }
  func.func @transform_4(%arg0: i32) -> (i32, i32) {
    %c0_i32 = arith.constant 0 : i32
    %c0_i32_0 = arith.constant 0 : i32
    %c0_i32_1 = arith.constant 0 : i32
    return %c0_i32, %c0_i32_0 : i32, i32
  }
  func.func @transform_5(%arg0: i32) -> (i32, i32) {
    %c0_i32 = arith.constant 0 : i32
    %c0_i32_0 = arith.constant 0 : i32
    %c0_i32_1 = arith.constant 0 : i32
    return %c0_i32, %c0_i32_0 : i32, i32
  }
  func.func @transform_6(%arg0: i32) -> (i32, i32) {
    %c0_i32 = arith.constant 0 : i32
    %c0_i32_0 = arith.constant 0 : i32
    %c0_i32_1 = arith.constant 0 : i32
    return %c0_i32, %c0_i32_0 : i32, i32
  }
  func.func @transform_7(%arg0: i32) -> (i32, i32) {
    %c0_i32 = arith.constant 0 : i32
    %c0_i32_0 = arith.constant 0 : i32
    return %arg0, %c0_i32 : i32, i32
  }
}

</mosaic_0001>

<bundles_post_ra>
// kernel: tpu_custom_call.1
= control target key start
LH: loop header
LB: loop body
LE: loop exit
PB: predicated region body
PF: predicated region fallthrough
CT: control target
= control target key end

     0   :  { %12 = vsyncpa [#allocation3], 0  ;;  %s446_s0 = inlined_call_operand.hbm [shape: f32[4,16], index: 0, kind: input, shape index: {}]   ;;  %s447_s1 = inlined_call_operand.hbm [shape: f32[16,32], index: 1, kind: input, shape index: {}]   ;;  %s448_s2 = inlined_call_operand.vmem [shape: f32[1,32], index: 2, kind: input, shape index: {}]   ;;  %s449_s3 = inlined_call_operand.hbm [shape: f32[32,32], index: 3, kind: input, shape index: {}]   ;;  %s450_s4 = inlined_call_operand.vmem [shape: f32[1,32], index: 4, kind: input, shape index: {}]   ;;  %s451_s5 = inlined_call_operand.hbm [shape: f32[32,128], index: 5, kind: input, shape index: {}]   ;;  %s452_s6 = inlined_call_operand.vmem [shape: f32[1,128], index: 6, kind: input, shape index: {}]   ;;  %s453_s7 = inlined_call_operand.hbm [shape: f32[4,8], index: 7, kind: output, shape index: {}]  }
   0x1   :  { %13 = vsyncpa [#allocation6], 0 }
   0x2   :  { %14 = vsyncpa [#allocation9], 0  ;;  %s31_s26 = sshll.u32 %s447_s1, 4  ;;  %s32_s26 = int_to_ptr.hbm [resolvable:$true] %s31_s26 }
   0x3   :  { %15 = vsyncpa [#allocation4], 0  ;;  %s375_s27 = smov [#allocation5]   ;;  %s21_s8 = sshll.u32 %s446_s0, 4  ;;  %s22_s8 = int_to_ptr.hbm [resolvable:$true] %s21_s8 }
   0x4   :  { %s33_s28 = sshll.u32 %s375_s27, 4  ;;  %s376_s9 = smov 128   ;;  %s34_s28 = int_to_ptr.vmem [resolvable:$true] %s33_s28 }
   0x5   :  { %s377_s10 = smov 8   ;;  %s378_s11 = smov [#allocation2]  }
   0x6   :  { %39 = dma.hbm_to_vmem [thread:$0]  %s32_s26, 256, %s34_s28, [#allocation6], %s376_s9, %s376_s9, %s377_s10  }
   0x7   :  { %s23_s12 = sshll.u32 %s378_s11, 4  ;;  %s46_s15 = sshll.u32 %s449_s3, 4  ;;  %s24_s12 = int_to_ptr.vmem [resolvable:$true] %s23_s12  ;;  %s47_s15 = int_to_ptr.hbm [resolvable:$true] %s46_s15 }
   0x8   :  { %26 = dma.hbm_to_vmem [thread:$0]  %s22_s8, 64, %s24_s12, [#allocation3]  }
   0x9   :  { %s61_s17 = sshll.u32 %s451_s5, 4  ;;  %s379_s18 = smov [#allocation7]   ;;  %s62_s17 = int_to_ptr.hbm [resolvable:$true] %s61_s17 }
   0xa   :  { %s48_s19 = sshll.u32 %s379_s18, 4  ;;  %s380_s0 = smov [#allocation8]   ;;  %s49_s19 = int_to_ptr.vmem [resolvable:$true] %s48_s19 }
   0xb   :  { %54 = dma.hbm_to_vmem [thread:$0]  %s47_s15, 512, %s49_s19, [#allocation6], %s376_s9, %s376_s9, %s377_s10  }
   0xc   :  { %s63_s20 = sshll.u32 %s380_s0, 4  ;;  %s64_s20 = int_to_ptr.vmem [resolvable:$true] %s63_s20 }
   0xd   :  { %69 = dma.hbm_to_vmem [thread:$0]  %s62_s17, 512, %s64_s20, [#allocation9], %s376_s9, %s376_s9, %s377_s10  }
   0xe   :  { %367 = dma.done.wait [#allocation3], 64  }
   0xf   :  { %368 = vsyncadd [#allocation3], 4294967232 }
  0x10   :  { %369 = dma.done.wait [#allocation6], 768  }
  0x11   :  { %370 = vsyncadd [#allocation6], 4294966528 }
  0x12   :  { %371 = dma.done.wait [#allocation9], 512  }
  0x13   :  { %372 = vsyncadd [#allocation9], 4294966784  ;;  %v90_v0 = vld [vmem:[#allocation5 + $0x8] sm:$0xff]  ;;  %v89_v1 = vld [vmem:[#allocation5] sm:$0xff]  ;;  %vm95_vm0 = vcmask 130048   ;;  %vm128_vm1 = vcmask 261120  }
  0x14   :  { %113 = vmatpush.msra.mxu0 %v90_v0  ;;  %v88_v2 = vld [vmem:[#allocation2] sm:$0xf]  ;;  %v123_v3 = vld [vmem:[#allocation7 + $0x18] sm:$0xff]  ;;  %v122_v4 = vld [vmem:[#allocation7 + $0x10] sm:$0xff]  ;;  %vm184_vm2 = vcmask 1043456   ;;  %s218_s26 = sshll.u32 %s453_s7, 4  ;;  %s219_s26 = int_to_ptr.hbm [resolvable:$true] %s218_s26 }
  0x15   :  { %144 = vmatpush.msra.mxu1 %v123_v3  ;;  %v121_v5 = vld [vmem:[#allocation7 + $0x8] sm:$0xff]  ;;  %v120_v6 = vld [vmem:[#allocation7] sm:$0xff]  ;;  %v156_v7 = vld [vmem:[#allocation8 + $0x18] sm:$0xff]  ;;  %vm209_vm7 = vcmask 60416  }
  0x16   :  { %114 = vmatpush.msra.mxu0 %v89_v1  ;;  %176 = vmatpush.msra.mxu2 %v156_v7  ;;  %v240_v8 = vld [vmem:[%s448_s2] ss:$0 sm:$0xff]  ;;  %v155_v12 = vld [vmem:[#allocation8 + $0x10] sm:$0xff]  ;;  %v153_v14 = vld [vmem:[#allocation8] sm:$0xff] }
  0x17   :  { %230 = vmatmul.msk.f32.vlgmr.msra.gmra.mxu0 %vm95_vm0, %v88_v2  ;;  %145 = vmatpush.msra.mxu1 %v122_v4  ;;  %v154_v13 = vld [vmem:[#allocation8 + $0x8] sm:$0xff] }
  0x18   :  { %177 = vmatpush.msra.mxu2 %v155_v12  ;;  %v241_v15 = vld [vmem:[%s450_s4] ss:$0 sm:$0xff]  ;;  %s381_s4 = smov [#allocation10]  }
  0x19   :  { %146 = vmatpush.msra.mxu1 %v121_v5  ;;  %v242_v19 = vld [vmem:[%s452_s6] ss:$0 sm:$0xff]  ;;  %s216_s6 = sshll.u32 %s381_s4, 4  ;;  %s217_s6 = int_to_ptr.vmem [resolvable:$true] %s216_s6 }
  0x1a   :  { %178 = vmatpush.msra.mxu2 %v154_v13 }
  0x1b   :  { %147 = vmatpush.msra.mxu1 %v120_v6 }
  0x1c   :  { %179 = vmatpush.msra.mxu2 %v153_v14 }
  0x94   :  { %v116_v9 = vpop.f32.mrf.mxu0 }
  0x95   :  { %v117_v10 = vadd.f32 %v240_v8, %v116_v9 }
  0x97   :  { %v119_v11 = vmax.f32 %v117_v10, 0.0 }
  0x99   :  { %231 = vmatmul.msk.f32.vlgmr.msra.gmra.mxu1 %vm128_vm1, %v119_v11 }
 0x116   :  { %v149_v16 = vpop.f32.mrf.mxu1 }
 0x117   :  { %v150_v17 = vadd.f32 %v241_v15, %v149_v16 }
 0x119   :  { %v152_v18 = vmax.f32 %v150_v17, 0.0 }
 0x11b   :  { %232 = vmatmul.msk.f32.vlgmr.msra.gmra.mxu2 %vm128_vm1, %v152_v18 }
 0x19e   :  { %v181_v20 = vpop.f32.mrf.mxu2 }
 0x19f   :  { %v182_v21 = vadd.f32 %v242_v19, %v181_v20 }
 0x1a1   :  { %v185_v22 = vsel %vm184_vm2, %v182_v21, -inf }
 0x1a2   :  { %186 = vmax.xlane.f32.xlu0 %v185_v22 }
 0x215   :  { %v187_v23 = vpop.xlane.xlu0 %186 }
 0x216   :  { %v188_v24 = vsub.f32 %v182_v21, %v187_v23 }
 0x218   :  { %v189_v25 = vmul.f32 1.442695, %v188_v24 }
 0x21a   :  { %243 = vpow2.f32 %v189_v25 }
 0x220   :  { %v244_v26 = vpop.eup %243 }
 0x221   :  { %v191_v27 = vsel %vm184_vm2, %v244_v26, 0.0 }
 0x222   :  { %192 = vadd.xlane.f32.xlu0 %v191_v27 }
 0x295   :  { %v193_v28 = vpop.xlane.xlu0 %192 }
 0x296   :  { %245 = vrcp.f32 %v193_v28  ;;  %v205_v32 = vand.u32 2147483648, %v193_v28  ;;  %v203_v34 = vand.u32 2147483647, %v193_v28  ;;  %vm199_vm4 = vweird.f32 %v193_v28 }
 0x298   :  { %v206_v36 = vor.u32 1.1754944e-38, %v205_v32  ;;  %vm204_vm6 = vcmp.eq.f32.partialorder %v203_v34, 8.507059e+37 }
 0x29c   :  { %v246_v29 = vpop.eup %245 }
 0x29d   :  { %v195_v30 = vmul.f32 %v246_v29, %v193_v28  ;;  %vm200_vm3 = vweird.f32 %v246_v29 }
 0x29e   :  { %vm201_vm5 = vmor %vm199_vm4, %vm200_vm3 }
 0x29f   :  { %v196_v31 = vsub.f32 1.0, %v195_v30 }
 0x2a1   :  { %v197_v33 = vmul.f32 %v246_v29, %v196_v31 }
 0x2a3   :  { %v198_v35 = vadd.f32 %v246_v29, %v197_v33 }
 0x2a5   :  { %v202_v37 = vsel %vm201_vm5, %v246_v29, %v198_v35 }
 0x2a6   :  { %v207_v38 = vsel %vm204_vm6, %v206_v36, %v202_v37 }
 0x2a7   :  { %v208_v39 = vmul.f32 %v244_v26, %v207_v38 }
 0x2a9   :  { %210 = vst.msk [vmem:[#allocation10] sm:$0xf] %vm209_vm7, %v208_v39 }
 0x2aa   :  { %221 = dma.vmem_to_hbm [thread:$0]  %s217_s6, 64, %s219_s26, [#allocation4]  }
 0x2ab   :  { %373 = dma.done.wait [#allocation4], 64  }
 0x2ac   :  { %374 = vsyncadd [#allocation4], 4294967232 }
 0x2ad   :  { %226 = vsyncpa [#allocation3], 1 }
 0x2ae   :  { %227 = vsyncpa [#allocation6], 1 }
 0x2af   :  { %228 = vsyncpa [#allocation9], 1 }
 0x2b0   :  { %229 = vsyncpa [#allocation4], 1 }

</bundles_post_ra>
